<compile_context>
chip_gen: v7x
topology: tpu7x:2x2x1
jax: 0.10.0
libtpu: 0.0.40
codegen_flags: <defaults>
</compile_context>

<pallas_src>
import jax
import jax.numpy as jnp
from jax.experimental import pallas as pl
from jax.experimental.pallas import tpu as pltpu


def siamese_kernel(xl_ref, xr_ref,
                   w1_ref, b1_ref,
                   w2_ref, b2_ref,
                   wfc_ref, bfc_ref,
                   out_ref):
    """Fused forward: twin MLP on both branches (one matmul per layer), abs-diff, head."""
    tb = xl_ref.shape[0]

    # --- Fused twin: stack both branches so w1/w2 pass through the MXU once. ---
    x = jnp.concatenate([xl_ref[...], xr_ref[...]], axis=0)          # (2*TB, D_in) bf16

    h = jnp.dot(x, w1_ref[...], preferred_element_type=jnp.float32) + b1_ref[...]
    h = jnp.maximum(h, 0.0)                                          # f32 epilogue
    z = jnp.dot(h.astype(w2_ref.dtype), w2_ref[...],
                preferred_element_type=jnp.float32) + b2_ref[...]    # (2*TB, OUT) f32

    # --- |z_l - z_r| ---
    d = jnp.abs(z[:tb] - z[tb:])                                     # (TB, OUT) f32

    # --- Head: Linear(OUT_DIM, 1) as a VPU reduction (avoids an N=1 MXU matmul). ---
    logits = jnp.sum(d * wfc_ref[...], axis=-1, keepdims=True) + bfc_ref[0, 0]
    out_ref[...] = jax.nn.sigmoid(logits).astype(out_ref.dtype)


def siamese_forward(x_l, x_r, params, *, batch_tile=512):
    """x_l, x_r: (B, C, H, W) float32. Returns (B, 1) float32."""
    w1, b1, w2, b2, wfc, bfc = params
    B = x_l.shape[0]
    d_in = x_l.shape[1] * x_l.shape[2] * x_l.shape[3]
    hidden = w1.shape[1]
    out_dim = w2.shape[1]

    # bf16 matmul operands (native MXU dtype; halves input/weight DMA bytes).
    xl = x_l.reshape(B, d_in).astype(jnp.bfloat16)
    xr = x_r.reshape(B, d_in).astype(jnp.bfloat16)
    w1b = w1.astype(jnp.bfloat16)
    w2b = w2.astype(jnp.bfloat16)
    wfc_row = wfc.reshape(1, out_dim)          # head weight as a lane-dense row
    bfc_s = bfc.reshape(1, 1)                  # scalar bias -> SMEM

    # Batch tile: full batch if small, otherwise a multiple of 8 (sublane rule).
    tb = B if B <= batch_tile else max(8, (batch_tile // 8) * 8)
    grid = (pl.cdiv(B, tb),)

    batch_spec = lambda shape: pl.BlockSpec(shape, lambda i: (i, 0),
                                            memory_space=pltpu.VMEM)
    whole_spec = lambda shape: pl.BlockSpec(shape, lambda i: (0, 0),
                                            memory_space=pltpu.VMEM)

    cost = pl.CostEstimate(
        flops=2 * 2 * B * (d_in * hidden + hidden * out_dim) + 2 * B * out_dim,
        transcendentals=B,
        bytes_accessed=(2 * (xl.size + xr.size)              # bf16 inputs
                        + 2 * (w1b.size + w2b.size)          # bf16 weights
                        + 4 * (b1.size + b2.size + wfc.size + bfc.size)
                        + 4 * B),                            # f32 output
    )

    return pl.pallas_call(
        siamese_kernel,
        out_shape=jax.ShapeDtypeStruct((B, 1), jnp.float32),
        grid=grid,
        in_specs=[
            batch_spec((tb, d_in)),                              # x_l tile (bf16)
            batch_spec((tb, d_in)),                              # x_r tile (bf16)
            whole_spec((d_in, hidden)),                          # w1 (bf16, resident)
            whole_spec((1, hidden)),                             # b1 (f32)
            whole_spec((hidden, out_dim)),                       # w2 (bf16, resident)
            whole_spec((1, out_dim)),                            # b2 (f32)
            whole_spec((1, out_dim)),                            # wfc row (f32)
            pl.BlockSpec(memory_space=pltpu.SMEM),               # bfc scalar
        ],
        out_specs=batch_spec((tb, 1)),
        compiler_params=pltpu.CompilerParams(
            dimension_semantics=("parallel",)),
        cost_estimate=cost,
    )(xl, xr, w1b, b1, w2b, b2, wfc_row, bfc_s)


def siamese_forward_ref(x_l, x_r, params):
    """Pure-JAX reference mirroring the kernel's bf16-matmul / f32-epilogue recipe."""
    w1, b1, w2, b2, wfc, bfc = params
    B = x_l.shape[0]
    xl = x_l.reshape(B, -1).astype(jnp.bfloat16)
    xr = x_r.reshape(B, -1).astype(jnp.bfloat16)
    w1b = w1.astype(jnp.bfloat16)
    w2b = w2.astype(jnp.bfloat16)

    def twin(x):
        h = jnp.dot(x, w1b, preferred_element_type=jnp.float32) + b1
        h = jnp.maximum(h, 0.0)
        return jnp.dot(h.astype(jnp.bfloat16), w2b,
                       preferred_element_type=jnp.float32) + b2

    d = jnp.abs(twin(xl) - twin(xr))
    logits = jnp.sum(d * wfc.reshape(1, -1), axis=-1, keepdims=True) + bfc.reshape(())
    return jax.nn.sigmoid(logits)


def siamese_forward_ref_f32(x_l, x_r, params):
    """Full-precision reference of the original module semantics."""
    w1, b1, w2, b2, wfc, bfc = params
    B = x_l.shape[0]
    xl = x_l.reshape(B, -1)
    xr = x_r.reshape(B, -1)

    def twin(x):
        h = jnp.maximum(x @ w1 + b1, 0.0)
        return h @ w2 + b2

    d = jnp.abs(twin(xl) - twin(xr))
    return jax.nn.sigmoid(d @ wfc + bfc)


def init_params(key, d_in, hidden, out_dim):
    k1, k2, k3 = jax.random.split(key, 3)
    scale1 = 1.0 / jnp.sqrt(d_in)
    scale2 = 1.0 / jnp.sqrt(hidden)
    scale3 = 1.0 / jnp.sqrt(out_dim)
    w1 = jax.random.uniform(k1, (d_in, hidden), jnp.float32, -scale1, scale1)
    b1 = jnp.zeros((1, hidden), jnp.float32)
    w2 = jax.random.uniform(k2, (hidden, out_dim), jnp.float32, -scale2, scale2)
    b2 = jnp.zeros((1, out_dim), jnp.float32)
    wfc = jax.random.uniform(k3, (out_dim, 1), jnp.float32, -scale3, scale3)
    bfc = jnp.zeros((1, 1), jnp.float32)
    return (w1, b1, w2, b2, wfc, bfc)


if __name__ == "__main__":
    # Small shapes consistent with a flattened-image twin network.
    B, C, H, W = 2, 4, 16, 16
    D_IN = C * H * W          # 1024
    HIDDEN = 256
    OUT_DIM = 128             # twin_net.output_dim

    key = jax.random.PRNGKey(0)
    kx, kp = jax.random.split(key)
    kxl, kxr = jax.random.split(kx)

    x_l = jax.random.normal(kxl, (B, C, H, W), jnp.float32)
    x_r = jax.random.normal(kxr, (B, C, H, W), jnp.float32)
    params = init_params(kp, D_IN, HIDDEN, OUT_DIM)

    out = jax.block_until_ready(siamese_forward(x_l, x_r, params))

    ref_bf16 = siamese_forward_ref(x_l, x_r, params)
    ref_f32 = siamese_forward_ref_f32(x_l, x_r, params)

    assert out.shape == (B, 1), out.shape
    assert jnp.allclose(out, ref_bf16, atol=2e-3, rtol=2e-3), (out, ref_bf16)
    assert jnp.allclose(out, ref_f32, atol=3e-2, rtol=3e-2), (out, ref_f32)

    print("KERNEL_OK")
</pallas_src>

<mosaic_0001>
module attributes {stable_mosaic.version = 11 : i64} {
  func.func @siamese_kernel(%arg0: i32, %arg1: memref<2x1024xbf16, #tpu.memory_space<vmem>>, %arg2: memref<2x1024xbf16, #tpu.memory_space<vmem>>, %arg3: memref<1024x256xbf16, #tpu.memory_space<vmem>>, %arg4: memref<1x256xf32, #tpu.memory_space<vmem>>, %arg5: memref<256x128xbf16, #tpu.memory_space<vmem>>, %arg6: memref<1x128xf32, #tpu.memory_space<vmem>>, %arg7: memref<1x128xf32, #tpu.memory_space<vmem>>, %arg8: memref<1x1xf32, #tpu.memory_space<smem>>, %arg9: memref<2x1xf32, #tpu.memory_space<vmem>>) attributes {dimension_semantics = [#tpu.dimension_semantics<parallel>], iteration_bounds = array<i64: 1>, scalar_prefetch = 0 : i64, scratch_operands = 0 : i64, tpu.core_type = #tpu.core_type<tc>, window_params = [{transform_indices = @transform_0, window_bounds = array<i64: 2, 1024>}, {transform_indices = @transform_1, window_bounds = array<i64: 2, 1024>}, {pipeline_mode = #tpu.pipeline_mode<synchronous>, transform_indices = @transform_2, window_bounds = array<i64: 1024, 256>}, {pipeline_mode = #tpu.pipeline_mode<synchronous>, transform_indices = @transform_3, window_bounds = array<i64: 1, 256>}, {pipeline_mode = #tpu.pipeline_mode<synchronous>, transform_indices = @transform_4, window_bounds = array<i64: 256, 128>}, {pipeline_mode = #tpu.pipeline_mode<synchronous>, transform_indices = @transform_5, window_bounds = array<i64: 1, 128>}, {pipeline_mode = #tpu.pipeline_mode<synchronous>, transform_indices = @transform_6, window_bounds = array<i64: 1, 128>}, {transform_indices = @transform_7, window_bounds = array<i64: 1, 1>}, {transform_indices = @transform_8, window_bounds = array<i64: 2, 1>}]} {
    %c0 = arith.constant 0 : index
    %c0_0 = arith.constant 0 : index
    %0 = vector.load %arg1[%c0, %c0_0] : memref<2x1024xbf16, #tpu.memory_space<vmem>>, vector<2x1024xbf16>
    %c0_1 = arith.constant 0 : index
    %c0_2 = arith.constant 0 : index
    %1 = vector.load %arg2[%c0_1, %c0_2] : memref<2x1024xbf16, #tpu.memory_space<vmem>>, vector<2x1024xbf16>
    %2 = tpu.concatenate %0, %1 in 0 : vector<2x1024xbf16>, vector<2x1024xbf16> -> vector<4x1024xbf16>
    %c0_3 = arith.constant 0 : index
    %c0_4 = arith.constant 0 : index
    %3 = vector.load %arg3[%c0_3, %c0_4] : memref<1024x256xbf16, #tpu.memory_space<vmem>>, vector<1024x256xbf16>
    %cst = arith.constant dense<0.000000e+00> : vector<4x256xf32>
    %4 = tpu.matmul %2, %3, %cst {dimension_numbers = #tpu.dot_dimension_numbers<[1], [0], [0], [1], [0, 0, 1, 1], [], []>} : vector<4x1024xbf16>, vector<1024x256xbf16>, vector<4x256xf32> -> vector<4x256xf32>
    %c0_5 = arith.constant 0 : index
    %c0_6 = arith.constant 0 : index
    %5 = vector.load %arg4[%c0_5, %c0_6] : memref<1x256xf32, #tpu.memory_space<vmem>>, vector<1x256xf32>
    %6 = vector.broadcast %5 : vector<1x256xf32> to vector<4x256xf32>
    %7 = arith.addf %4, %6 : vector<4x256xf32>
    %cst_7 = arith.constant 0.000000e+00 : f32
    %8 = vector.broadcast %cst_7 : f32 to vector<4x256xf32>
    %9 = arith.maximumf %7, %8 : vector<4x256xf32>
    %10 = arith.truncf %9 : vector<4x256xf32> to vector<4x256xbf16>
    %c0_8 = arith.constant 0 : index
    %c0_9 = arith.constant 0 : index
    %11 = vector.load %arg5[%c0_8, %c0_9] : memref<256x128xbf16, #tpu.memory_space<vmem>>, vector<256x128xbf16>
    %cst_10 = arith.constant dense<0.000000e+00> : vector<4x128xf32>
    %12 = tpu.matmul %10, %11, %cst_10 {dimension_numbers = #tpu.dot_dimension_numbers<[1], [0], [0], [1], [0, 0, 1, 1], [], []>} : vector<4x256xbf16>, vector<256x128xbf16>, vector<4x128xf32> -> vector<4x128xf32>
    %c0_11 = arith.constant 0 : index
    %c0_12 = arith.constant 0 : index
    %13 = vector.load %arg6[%c0_11, %c0_12] : memref<1x128xf32, #tpu.memory_space<vmem>>, vector<1x128xf32>
    %14 = vector.broadcast %13 : vector<1x128xf32> to vector<4x128xf32>
    %15 = arith.addf %12, %14 : vector<4x128xf32>
    %16 = vector.extract_strided_slice %15 {offsets = [0, 0], sizes = [2, 128], strides = [1, 1]} : vector<4x128xf32> to vector<2x128xf32>
    %17 = vector.extract_strided_slice %15 {offsets = [2, 0], sizes = [2, 128], strides = [1, 1]} : vector<4x128xf32> to vector<2x128xf32>
    %18 = arith.subf %16, %17 : vector<2x128xf32>
    %19 = math.absf %18 : vector<2x128xf32>
    %c0_13 = arith.constant 0 : index
    %c0_14 = arith.constant 0 : index
    %20 = vector.load %arg7[%c0_13, %c0_14] : memref<1x128xf32, #tpu.memory_space<vmem>>, vector<1x128xf32>
    %21 = vector.broadcast %20 : vector<1x128xf32> to vector<2x128xf32>
    %22 = arith.mulf %19, %21 : vector<2x128xf32>
    %cst_15 = arith.constant dense<0.000000e+00> : vector<2xf32>
    %23 = vector.multi_reduction <add>, %22, %cst_15 [1] : vector<2x128xf32> to vector<2xf32>
    %24 = vector.shape_cast %23 : vector<2xf32> to vector<2x1xf32>
    %c0_16 = arith.constant 0 : index
    %c0_17 = arith.constant 0 : index
    %25 = memref.load %arg8[%c0_16, %c0_17] : memref<1x1xf32, #tpu.memory_space<smem>>
    %26 = vector.broadcast %25 : f32 to vector<2x1xf32>
    %27 = arith.addf %24, %26 : vector<2x1xf32>
    %28 = arith.negf %27 : vector<2x1xf32>
    %29 = math.exp %28 : vector<2x1xf32>
    %cst_18 = arith.constant 1.000000e+00 : f32
    %30 = vector.broadcast %cst_18 : f32 to vector<2x1xf32>
    %31 = arith.addf %30, %29 : vector<2x1xf32>
    %32 = arith.divf %30, %31 : vector<2x1xf32>
    %c0_19 = arith.constant 0 : index
    %c0_20 = arith.constant 0 : index
    %33 = vector.load %arg9[%c0_19, %c0_20] : memref<2x1xf32, #tpu.memory_space<vmem>>, vector<2x1xf32>
    tpu.vector_store %arg9[%c0_19, %c0_20], %32 {strides = array<i32>} : memref<2x1xf32, #tpu.memory_space<vmem>>, vector<2x1xf32>,
    return
  }
  func.func @transform_0(%arg0: i32) -> (i32, i32) {
    %c0_i32 = arith.constant 0 : i32
    %c0_i32_0 = arith.constant 0 : i32
    return %arg0, %c0_i32 : i32, i32
  }
  func.func @transform_1(%arg0: i32) -> (i32, i32) {
    %c0_i32 = arith.constant 0 : i32
    %c0_i32_0 = arith.constant 0 : i32
    return %arg0, %c0_i32 : i32, i32
  }
  func.func @transform_2(%arg0: i32) -> (i32, i32) {
    %c0_i32 = arith.constant 0 : i32
    %c0_i32_0 = arith.constant 0 : i32
    %c0_i32_1 = arith.constant 0 : i32
    return %c0_i32, %c0_i32_0 : i32, i32
  }
  func.func @transform_3(%arg0: i32) -> (i32, i32) {
    %c0_i32 = arith.constant 0 : i32
    %c0_i32_0 = arith.constant 0 : i32
    %c0_i32_1 = arith.constant 0 : i32
    return %c0_i32, %c0_i32_0 : i32, i32
  }
  func.func @transform_4(%arg0: i32) -> (i32, i32) {
    %c0_i32 = arith.constant 0 : i32
    %c0_i32_0 = arith.constant 0 : i32
    %c0_i32_1 = arith.constant 0 : i32
    return %c0_i32, %c0_i32_0 : i32, i32
  }
  func.func @transform_5(%arg0: i32) -> (i32, i32) {
    %c0_i32 = arith.constant 0 : i32
    %c0_i32_0 = arith.constant 0 : i32
    %c0_i32_1 = arith.constant 0 : i32
    return %c0_i32, %c0_i32_0 : i32, i32
  }
  func.func @transform_6(%arg0: i32) -> (i32, i32) {
    %c0_i32 = arith.constant 0 : i32
    %c0_i32_0 = arith.constant 0 : i32
    %c0_i32_1 = arith.constant 0 : i32
    return %c0_i32, %c0_i32_0 : i32, i32
  }
  func.func @transform_7(%arg0: i32) -> (i32, i32) {
    %c0_i32 = arith.constant 0 : i32
    %c0_i32_0 = arith.constant 0 : i32
    %c0_i32_1 = arith.constant 0 : i32
    return %c0_i32, %c0_i32_0 : i32, i32
  }
  func.func @transform_8(%arg0: i32) -> (i32, i32) {
    %c0_i32 = arith.constant 0 : i32
    %c0_i32_0 = arith.constant 0 : i32
    return %arg0, %c0_i32 : i32, i32
  }
}

</mosaic_0001>

<bundles_post_ra>
// kernel: tpu_custom_call.1
= control target key start
LH: loop header
LB: loop body
LE: loop exit
PB: predicated region body
PF: predicated region fallthrough
CT: control target
= control target key end

     0   :  { %14 = vsyncpa [#allocation4], 0  ;;  %s2037_s0 = inlined_call_operand.hbm [shape: bf16[2,1024], index: 0, kind: input, shape index: {}]   ;;  %s2038_s1 = inlined_call_operand.hbm [shape: bf16[2,1024], index: 1, kind: input, shape index: {}]   ;;  %s2039_s2 = inlined_call_operand.hbm [shape: bf16[1024,256], index: 2, kind: input, shape index: {}]   ;;  %s2040_s3 = inlined_call_operand.vmem [shape: f32[1,256], index: 3, kind: input, shape index: {}]   ;;  %s2041_s4 = inlined_call_operand.hbm [shape: bf16[256,128], index: 4, kind: input, shape index: {}]   ;;  %s2042_s5 = inlined_call_operand.vmem [shape: f32[1,128], index: 5, kind: input, shape index: {}]   ;;  %s2043_s6 = inlined_call_operand.vmem [shape: f32[1,128], index: 6, kind: input, shape index: {}]   ;;  %s2044_s7 = inlined_call_operand.<no memory space> [shape: f32[1,1], index: 7, kind: input, shape index: {}]   ;;  %s2045_s8 = inlined_call_operand.vmem [shape: f32[2,1], index: 8, kind: output, shape index: {}]  }
   0x1   :  { %15 = vsyncpa [#allocation6], 0 }
   0x2   :  { %16 = vsyncpa [#allocation9], 0  ;;  %s1873_s27 = smov [#allocation5]   ;;  %s1874_s29 = smov [#allocation3]  }
   0x3   :  { %s33_s28 = sshll.u32 %s1873_s27, 4  ;;  %s23_s30 = sshll.u32 %s1874_s29, 4  ;;  %s34_s28 = int_to_ptr.vmem [resolvable:$true] %s33_s28  ;;  %s24_s30 = int_to_ptr.vmem [resolvable:$true] %s23_s30 }
   0x4   :  { %s1779_s11 = scalar_lea.hbm %s2038_s1, 128 }
   0x5   :  { %p1780_p0 = scmp.ne.s32.totalorder %s2038_s1, %s1779_s11  ;;  %p1783_p1 = scmp.lt.u32.totalorder %s1779_s11, %s2038_s1 }
   0x7   :  { %p1785_p2 = pnand %p1783_p1, %p1780_p0 }
   0x9   :  { %1788 = shalt.err (!%p1785_p2)
}
   0xa   :  { %s1789_s16 = scalar_lea.vmem %s34_s28, 128  ;;  %p1794_p4 = scmp.lt.s32.totalorder %s34_s28, %s34_s28 }
   0xb   :  { %p1790_p3 = scmp.ne.s32.totalorder %s34_s28, %s1789_s16  ;;  %p1795_p5 = scmp.lt.s32.totalorder %s1789_s16, %s1789_s16 }
   0xd   :  { %p1796_p6 = por %p1795_p5, %p1794_p4 }
   0xf   :  { %p1797_p7 = pnand %p1796_p6, %p1790_p3 }
  0x11   :  { %1800 = shalt.err (!%p1797_p7)
}
  0x12   :  { %36 = dma.hbm_to_vmem [thread:$0]  %s2038_s1, 128, %s34_s28, [#allocation6]  }
  0x13   :  { %s1801_s21 = scalar_lea.hbm %s2037_s0, 128 }
  0x14   :  { %p1802_p8 = scmp.ne.s32.totalorder %s2037_s0, %s1801_s21  ;;  %p1805_p9 = scmp.lt.u32.totalorder %s1801_s21, %s2037_s0 }
  0x16   :  { %p1807_p10 = pnand %p1805_p9, %p1802_p8 }
  0x18   :  { %1810 = shalt.err (!%p1807_p10)
}
  0x19   :  { %s1811_s26 = scalar_lea.vmem %s24_s30, 128  ;;  %p1816_p12 = scmp.lt.s32.totalorder %s24_s30, %s24_s30 }
  0x1a   :  { %p1812_p11 = scmp.ne.s32.totalorder %s24_s30, %s1811_s26  ;;  %p1817_p13 = scmp.lt.s32.totalorder %s1811_s26, %s1811_s26 }
  0x1c   :  { %p1818_p0 = por %p1817_p13, %p1816_p12 }
  0x1e   :  { %p1819_p1 = pnand %p1818_p0, %p1812_p11 }
  0x20   :  { %1822 = shalt.err (!%p1819_p1)
}
  0x21   :  { %26 = dma.hbm_to_vmem [thread:$0]  %s2037_s0, 128, %s24_s30, [#allocation4]  }
  0x22   :  { %s1875_s28 = smov [#allocation7]   ;;  %s1823_s11 = scalar_lea.hbm %s2039_s2, 16384 }
  0x23   :  { %s42_s29 = sshll.u32 %s1875_s28, 4  ;;  %p1824_p2 = scmp.ne.s32.totalorder %s2039_s2, %s1823_s11  ;;  %s43_s29 = int_to_ptr.vmem [resolvable:$true] %s42_s29 }
  0x24   :  { %p1827_p3 = scmp.lt.u32.totalorder %s1823_s11, %s2039_s2 }
  0x26   :  { %p1829_p4 = pnand %p1827_p3, %p1824_p2 }
  0x28   :  { %1832 = shalt.err (!%p1829_p4)
}
  0x29   :  { %s1833_s16 = scalar_lea.vmem %s43_s29, 16384  ;;  %p1838_p6 = scmp.lt.s32.totalorder %s43_s29, %s43_s29 }
  0x2a   :  { %p1834_p5 = scmp.ne.s32.totalorder %s43_s29, %s1833_s16  ;;  %p1839_p7 = scmp.lt.s32.totalorder %s1833_s16, %s1833_s16 }
  0x2c   :  { %p1840_p8 = por %p1839_p7, %p1838_p6 }
  0x2e   :  { %p1841_p9 = pnand %p1840_p8, %p1834_p5 }
  0x30   :  { %1844 = shalt.err (!%p1841_p9)
}
  0x31   :  { %s1876_s0 = smov 128   ;;  %s1877_s30 = smov 8  }
  0x32   :  { %48 = dma.hbm_to_vmem [thread:$0]  %s2039_s2, 16384, %s43_s29, [#allocation6], %s1876_s0, %s1876_s0, %s1877_s30  }
  0x33   :  { %s1878_s19 = smov [#allocation8]   ;;  %s1845_s23 = scalar_lea.hbm %s2041_s4, 2048 }
  0x34   :  { %s56_s20 = sshll.u32 %s1878_s19, 4  ;;  %p1846_p10 = scmp.ne.s32.totalorder %s2041_s4, %s1845_s23  ;;  %s57_s20 = int_to_ptr.vmem [resolvable:$true] %s56_s20 }
  0x35   :  { %p1849_p11 = scmp.lt.u32.totalorder %s1845_s23, %s2041_s4 }
  0x37   :  { %p1851_p12 = pnand %p1849_p11, %p1846_p10 }
  0x39   :  { %1854 = shalt.err (!%p1851_p12)
}
  0x3a   :  { %s1855_s27 = scalar_lea.vmem %s57_s20, 2048  ;;  %p1860_p0 = scmp.lt.s32.totalorder %s57_s20, %s57_s20 }
  0x3b   :  { %p1856_p13 = scmp.ne.s32.totalorder %s57_s20, %s1855_s27  ;;  %p1861_p1 = scmp.lt.s32.totalorder %s1855_s27, %s1855_s27 }
  0x3d   :  { %p1862_p2 = por %p1861_p1, %p1860_p0 }
  0x3f   :  { %p1863_p3 = pnand %p1862_p2, %p1856_p13 }
  0x41   :  { %1866 = shalt.err (!%p1863_p3)
}
  0x42   :  { %s1879_s2 = smov 64   ;;  %s1880_s28 = smov 4  }
  0x43   :  { %62 = dma.hbm_to_vmem [thread:$0]  %s2041_s4, 2048, %s57_s20, [#allocation9], %s1879_s2, %s1879_s2, %s1880_s28  }
  0x44   :  { %1867 = dma.done.wait [#allocation4], 128  }
  0x45   :  { %1868 = vsyncadd [#allocation4], 4294967168 }
  0x46   :  { %1869 = dma.done.wait [#allocation6], 16512  }
  0x47   :  { %1870 = vsyncadd [#allocation6], 4294950784 }
  0x48   :  { %1871 = dma.done.wait [#allocation9], 2048  }
  0x49   :  { %1872 = vsyncadd [#allocation9], 4294965248  ;;  %v1565_v0 = vld [vmem:[#allocation7 + $0x4] ss:$8 sps:$4 sm:$0xff]   ;;  %v1569_v2 = vld [vmem:[#allocation7] ss:$8 sps:$4 sm:$0xff]   ;;  %v89_v38 = vlaneseq }
  0x4a   :  { %v1567_v1 = vld [vmem:[#allocation7 + $0x204] ss:$8 sps:$4 sm:$0xff]   ;;  %997 = vmatprep.subr.bf16.mxu1 %v1565_v0  ;;  %v1570_v3 = vld [vmem:[#allocation7 + $0x200] ss:$8 sps:$4 sm:$0xff]   ;;  %v1571_v4 = vld [vmem:[#allocation7 + $0x14] ss:$8 sps:$4 sm:$0xff]  }
  0x4b   :  { %1079 = vmatprep.subr.bf16.mxu0 %v1567_v1  ;;  %998 = vmatpush1.bf16.msra.mxu1 %v1569_v2  ;;  %v1573_v5 = vld [vmem:[#allocation7 + $0x214] ss:$8 sps:$4 sm:$0xff]   ;;  %v1575_v6 = vld [vmem:[#allocation7 + $0x10] ss:$8 sps:$4 sm:$0xff]   ;;  %v1577_v8 = vld [vmem:[#allocation7 + $0x24] ss:$8 sps:$4 sm:$0xff]  }
  0x4c   :  { %1080 = vmatpush1.bf16.msra.mxu0 %v1570_v3  ;;  %999 = vmatprep.subr.bf16.mxu1 %v1571_v4  ;;  %v1576_v7 = vld [vmem:[#allocation7 + $0x210] ss:$8 sps:$4 sm:$0xff]   ;;  %v1579_v9 = vld [vmem:[#allocation7 + $0x224] ss:$8 sps:$4 sm:$0xff]   ;;  %v1581_v10 = vld [vmem:[#allocation7 + $0x20] ss:$8 sps:$4 sm:$0xff]  }
  0x4d   :  { %1081 = vmatprep.subr.bf16.mxu0 %v1573_v5  ;;  %v1582_v11 = vld [vmem:[#allocation7 + $0x220] ss:$8 sps:$4 sm:$0xff]   ;;  %v1583_v12 = vld [vmem:[#allocation7 + $0x34] ss:$8 sps:$4 sm:$0xff]   ;;  %v1587_v14 = vld [vmem:[#allocation7 + $0x30] ss:$8 sps:$4 sm:$0xff]  }
  0x4e   :  { %v1585_v13 = vld [vmem:[#allocation7 + $0x234] ss:$8 sps:$4 sm:$0xff]   ;;  %v1588_v15 = vld [vmem:[#allocation7 + $0x230] ss:$8 sps:$4 sm:$0xff]   ;;  %v1589_v16 = vld [vmem:[#allocation7 + $0x44] ss:$8 sps:$4 sm:$0xff]  }
  0x4f   :  { %1000 = vmatpush1.bf16.msra.mxu1 %v1575_v6  ;;  %v1591_v17 = vld [vmem:[#allocation7 + $0x244] ss:$8 sps:$4 sm:$0xff]   ;;  %v1593_v18 = vld [vmem:[#allocation7 + $0x40] ss:$8 sps:$4 sm:$0xff]   ;;  %v1595_v20 = vld [vmem:[#allocation7 + $0x54] ss:$8 sps:$4 sm:$0xff]  }
  0x50   :  { %1082 = vmatpush1.bf16.msra.mxu0 %v1576_v7  ;;  %1001 = vmatprep.subr.bf16.mxu1 %v1577_v8  ;;  %v1594_v19 = vld [vmem:[#allocation7 + $0x240] ss:$8 sps:$4 sm:$0xff]   ;;  %v1597_v21 = vld [vmem:[#allocation7 + $0x254] ss:$8 sps:$4 sm:$0xff]   ;;  %v1599_v22 = vld [vmem:[#allocation7 + $0x50] ss:$8 sps:$4 sm:$0xff]  }
  0x51   :  { %1083 = vmatprep.subr.bf16.mxu0 %v1579_v9  ;;  %v1600_v23 = vld [vmem:[#allocation7 + $0x250] ss:$8 sps:$4 sm:$0xff]   ;;  %v1601_v24 = vld [vmem:[#allocation7 + $0x64] ss:$8 sps:$4 sm:$0xff]   ;;  %v1605_v26 = vld [vmem:[#allocation7 + $0x60] ss:$8 sps:$4 sm:$0xff]  }
  0x52   :  { %v1603_v25 = vld [vmem:[#allocation7 + $0x264] ss:$8 sps:$4 sm:$0xff]   ;;  %v1606_v27 = vld [vmem:[#allocation7 + $0x260] ss:$8 sps:$4 sm:$0xff]   ;;  %v1607_v28 = vld [vmem:[#allocation7 + $0x74] ss:$8 sps:$4 sm:$0xff]  }
  0x53   :  { %1002 = vmatpush1.bf16.msra.mxu1 %v1581_v10  ;;  %v1609_v29 = vld [vmem:[#allocation7 + $0x274] ss:$8 sps:$4 sm:$0xff]   ;;  %v1611_v30 = vld [vmem:[#allocation7 + $0x70] ss:$8 sps:$4 sm:$0xff]   ;;  %v1613_v32 = vld [vmem:[#allocation7 + $0x84] ss:$8 sps:$4 sm:$0xff]  }
  0x54   :  { %1084 = vmatpush1.bf16.msra.mxu0 %v1582_v11  ;;  %1003 = vmatprep.subr.bf16.mxu1 %v1583_v12  ;;  %v1612_v31 = vld [vmem:[#allocation7 + $0x270] ss:$8 sps:$4 sm:$0xff]   ;;  %v1615_v33 = vld [vmem:[#allocation7 + $0x284] ss:$8 sps:$4 sm:$0xff]   ;;  %v1617_v34 = vld [vmem:[#allocation7 + $0x80] ss:$8 sps:$4 sm:$0xff]  }
  0x55   :  { %1085 = vmatprep.subr.bf16.mxu0 %v1585_v13  ;;  %v1618_v35 = vld [vmem:[#allocation7 + $0x280] ss:$8 sps:$4 sm:$0xff]   ;;  %v1881_v36 = vmov 1966171168   ;;  %v1619_v39 = vld [vmem:[#allocation7 + $0x94] ss:$8 sps:$4 sm:$0xff]  }
  0x56   :  { %v87_v37 = vunpack.c.l.s4 %v1881_v36  ;;  %v1621_v40 = vld [vmem:[#allocation7 + $0x294] ss:$8 sps:$4 sm:$0xff]   ;;  %v1623_v41 = vld [vmem:[#allocation7 + $0x90] ss:$8 sps:$4 sm:$0xff]   ;;  %v1975_v43 = vshrl.u32 %v89_v38, 7  ;;  %vm184_vm0 = vcmask 1040384  }
  0x57   :  { %1004 = vmatpush1.bf16.msra.mxu1 %v1587_v14  ;;  %v1624_v44 = vld [vmem:[#allocation7 + $0x290] ss:$8 sps:$4 sm:$0xff]   ;;  %v1625_v45 = vld [vmem:[#allocation7 + $0xa4] ss:$8 sps:$4 sm:$0xff]   ;;  %v1629_v47 = vld [vmem:[#allocation7 + $0xa0] ss:$8 sps:$4 sm:$0xff]  }
  0x58   :  { %1086 = vmatpush1.bf16.msra.mxu0 %v1588_v15  ;;  %1005 = vmatprep.subr.bf16.mxu1 %v1589_v16  ;;  %v88_v42 = vunpack.c.0.s8 %v87_v37  ;;  %v1627_v46 = vld [vmem:[#allocation7 + $0x2a4] ss:$8 sps:$4 sm:$0xff]   ;;  %v1630_v48 = vld [vmem:[#allocation7 + $0x2a0] ss:$8 sps:$4 sm:$0xff]   ;;  %v1631_v50 = vld [vmem:[#allocation7 + $0xb4] ss:$8 sps:$4 sm:$0xff]  }
  0x59   :  { %1087 = vmatprep.subr.bf16.mxu0 %v1591_v17  ;;  %v1633_v51 = vld [vmem:[#allocation7 + $0x2b4] ss:$8 sps:$4 sm:$0xff]   ;;  %v1635_v56 = vld [vmem:[#allocation7 + $0xb0] ss:$8 sps:$4 sm:$0xff]   ;;  %v1637_v60 = vld [vmem:[#allocation7 + $0xc4] ss:$8 sps:$4 sm:$0xff]  }
  0x5a   :  { %v1978_v49 = vsub.s32 %v88_v42, %v1975_v43  ;;  %v82_v52 = vld [vmem:[#allocation3] sm:$0xff]  ;;  %v83_v53 = vld [vmem:[#allocation5] sm:$0xff]  ;;  %v1639_v61 = vld [vmem:[#allocation7 + $0x2c4] ss:$8 sps:$4 sm:$0xff]   ;;  %vm1353_vm1 = vcmask 1041408   ;;  %vm1366_vm2 = vcmask 1024  }
  0x5b   :  { %1006 = vmatpush1.bf16.msra.mxu1 %v1593_v18  ;;  %v85_v55 = vcombine.high %v82_v52, %v82_v52  ;;  %v1636_v57 = vld [vmem:[#allocation7 + $0x2b0] ss:$8 sps:$4 sm:$0xff]   ;;  %v135_v58 = vcombine.low %v83_v53, %v83_v53  ;;  %v1641_v3 = vld [vmem:[#allocation7 + $0xc0] ss:$8 sps:$4 sm:$0xff]   ;;  %v1643_v8 = vld [vmem:[#allocation7 + $0xd4] ss:$8 sps:$4 sm:$0xff]  }
  0x5c   :  { %1088 = vmatpush1.bf16.msra.mxu0 %v1594_v19  ;;  %1007 = vmatprep.subr.bf16.mxu1 %v1595_v20  ;;  %v92_v54 = vrot.slane %v82_v52, %v1978_v49  ;;  %v149_v59 = vrot.slane %v83_v53, %v1978_v49  ;;  %v1642_v4 = vld [vmem:[#allocation7 + $0x2c0] ss:$8 sps:$4 sm:$0xff]   ;;  %v1645_v9 = vld [vmem:[#allocation7 + $0x2d4] ss:$8 sps:$4 sm:$0xff]   ;;  %v1647_v13 = vld [vmem:[#allocation7 + $0xd0] ss:$8 sps:$4 sm:$0xff]  }
  0x5d   :  { %1089 = vmatprep.subr.bf16.mxu0 %v1597_v21  ;;  %v99_v63 = vrot.slane %v85_v55, %v1978_v49  ;;  %v142_v0 = vrot.slane %v135_v58, %v1978_v49  ;;  %v1648_v14 = vld [vmem:[#allocation7 + $0x2d0] ss:$8 sps:$4 sm:$0xff]   ;;  %v1649_v16 = vld [vmem:[#allocation7 + $0xe4] ss:$8 sps:$4 sm:$0xff]   ;;  %v1653_v18 = vld [vmem:[#allocation7 + $0xe0] ss:$8 sps:$4 sm:$0xff]  }
  0x5e   :  { %v100_v62 = vcombine.high %v92_v54, %v92_v54  ;;  %v151_v1 = vcombine.high %v149_v59, %v149_v59  ;;  %v1651_v17 = vld [vmem:[#allocation7 + $0x2e4] ss:$8 sps:$4 sm:$0xff]   ;;  %v1654_v19 = vld [vmem:[#allocation7 + $0x2e0] ss:$8 sps:$4 sm:$0xff]   ;;  %v1655_v20 = vld [vmem:[#allocation7 + $0xf4] ss:$8 sps:$4 sm:$0xff]  }
  0x5f   :  { %1008 = vmatpush1.bf16.msra.mxu1 %v1599_v22  ;;  %v101_v2 = vcombine.high %v99_v63, %v99_v63  ;;  %v150_v6 = vcombine.high %v142_v0, %v142_v0  ;;  %v1657_v21 = vld [vmem:[#allocation7 + $0x2f4] ss:$8 sps:$4 sm:$0xff]   ;;  %v1991_v22 = vrot.slane %v92_v54, %v1978_v49  ;;  %v1669_v42 = vld [vmem:[#allocation7 + $0x110] ss:$8 sps:$4 sm:$0xff]   ;;  %v1689_v53 = vld [vmem:[#allocation7 + $0x144] ss:$8 sps:$4 sm:$0xff]  }
  0x60   :  { %1090 = vmatpush1.bf16.msra.mxu0 %v1600_v23  ;;  %1009 = vmatprep.subr.bf16.mxu1 %v1601_v24  ;;  %v122_v5 = vrot.slane %v100_v62, %v1978_v49  ;;  %v179_v7 = vrot.slane %v151_v1, %v1978_v49  ;;  %v1659_v23 = vld [vmem:[#allocation7 + $0xf0] ss:$8 sps:$4 sm:$0xff]   ;;  %v1671_v38 = vld [vmem:[#allocation7 + $0x114] ss:$8 sps:$4 sm:$0xff]   ;;  %v1692_v54 = vld [vmem:[#allocation7 + $0x344] ss:$8 sps:$4 sm:$0xff]  }
  0x61   :  { %1091 = vmatprep.subr.bf16.mxu0 %v1603_v25  ;;  %v129_v10 = vrot.slane %v101_v2, %v1978_v49  ;;  %v172_v11 = vrot.slane %v150_v6, %v1978_v49  ;;  %v1660_v24 = vld [vmem:[#allocation7 + $0x2f0] ss:$8 sps:$4 sm:$0xff]   ;;  %v1994_v25 = vrot.slane %v142_v0, %v1978_v49  ;;  %v1687_v55 = vld [vmem:[#allocation7 + $0x140] ss:$8 sps:$4 sm:$0xff]   ;;  %v1698_v58 = vld [vmem:[#allocation7 + $0x354] ss:$8 sps:$4 sm:$0xff]  }
  0x62   :  { %v1684_v52 = vld [vmem:[#allocation7 + $0x330] ss:$8 sps:$4 sm:$0xff]   ;;  %v1704_v62 = vld [vmem:[#allocation7 + $0x364] ss:$8 sps:$4 sm:$0xff]   ;;  %v1702_v0 = vld [vmem:[#allocation7 + $0x360] ss:$8 sps:$4 sm:$0xff]  }
  0x63   :  { %1010 = vmatpush1.bf16.msra.mxu1 %v1605_v26  ;;  %v207_v12 = vsel %vm184_vm0, %v129_v10, %v179_v7  ;;  %v191_v15 = vsel %vm184_vm0, %v122_v5, %v172_v11  ;;  %v1997_v26 = vrot.slane %v99_v63, %v1978_v49  ;;  %v187_v36 = vsel %vm184_vm0, %v1991_v22, %v1994_v25  ;;  %v1699_v63 = vld [vmem:[#allocation7 + $0x160] ss:$8 sps:$4 sm:$0xff]   ;;  %v1707_v1 = vld [vmem:[#allocation7 + $0x174] ss:$8 sps:$4 sm:$0xff]   ;;  %v1716_v6 = vld [vmem:[#allocation7 + $0x384] ss:$8 sps:$4 sm:$0xff]  }
  0x64   :  { %1092 = vmatpush1.bf16.msra.mxu0 %v1606_v27  ;;  %1011 = vmatprep.subr.bf16.mxu1 %v1607_v28  ;;  %v2000_v27 = vrot.slane %v149_v59, %v1978_v49  ;;  %v1664_v28 = vld [vmem:[#allocation7 + $0x104] ss:$8 sps:$4 sm:$0xff]   ;;  %v1683_v49 = vld [vmem:[#allocation7 + $0x134] ss:$8 sps:$4 sm:$0xff]   ;;  %v1693_v59 = vld [vmem:[#allocation7 + $0x150] ss:$8 sps:$4 sm:$0xff]  }
  0x65   :  { %1093 = vmatprep.subr.bf16.mxu0 %v1609_v29  ;;  %1029 = vmatprep.mubr.bf16.mxu1 %v191_v15  ;;  %v1668_v29 = vld [vmem:[#allocation7 + $0x304] ss:$8 sps:$4 sm:$0xff]   ;;  %v1710_v2 = vld [vmem:[#allocation7 + $0x374] ss:$8 sps:$4 sm:$0xff]   ;;  %v1723_v15 = vld [vmem:[#allocation7 + $0x1a0] ss:$8 sps:$4 sm:$0xff]  }
  0x66   :  { %1111 = vmatprep.mubr.bf16.mxu0 %v207_v12  ;;  %v203_v37 = vsel %vm184_vm0, %v1997_v26, %v2000_v27  ;;  %v1720_v12 = vld [vmem:[#allocation7 + $0x390] ss:$8 sps:$4 sm:$0xff]  }
  0x67   :  { %1012 = vmatpush1.bf16.msra.mxu1 %v1611_v30  ;;  %v132_v30 = vcombine.high %v122_v5, %v122_v5  ;;  %v1713_v5 = vld [vmem:[#allocation7 + $0x184] ss:$8 sps:$4 sm:$0xff]  }
  0x68   :  { %1094 = vmatpush1.bf16.msra.mxu0 %v1612_v31  ;;  %1013 = vmatprep.subr.bf16.mxu1 %v1613_v32  ;;  %v182_v31 = vcombine.high %v172_v11, %v172_v11  ;;  %v133_v32 = vcombine.high %v129_v10, %v129_v10  ;;  %v1722_v10 = vld [vmem:[#allocation7 + $0x394] ss:$8 sps:$4 sm:$0xff]   ;;  %v1717_v11 = vld [vmem:[#allocation7 + $0x190] ss:$8 sps:$4 sm:$0xff]  }
  0x69   :  { %1095 = vmatprep.subr.bf16.mxu0 %v1615_v33  ;;  %v183_v33 = vcombine.high %v179_v7, %v179_v7  ;;  %v1711_v7 = vld [vmem:[#allocation7 + $0x180] ss:$8 sps:$4 sm:$0xff]  }
  0x6b   :  { %1014 = vmatpush1.bf16.msra.mxu1 %v1617_v34  ;;  %v1662_v34 = vld [vmem:[#allocation7 + $0x100] ss:$8 sps:$4 sm:$0xff]  }
  0x6c   :  { %1096 = vmatpush1.bf16.msra.mxu0 %v1618_v35  ;;  %1015 = vmatprep.subr.bf16.mxu1 %v1619_v39  ;;  %v1666_v35 = vld [vmem:[#allocation7 + $0x300] ss:$8 sps:$4 sm:$0xff]   ;;  %v1674_v39 = vld [vmem:[#allocation7 + $0x314] ss:$8 sps:$4 sm:$0xff]  }
  0x6d   :  { %1097 = vmatprep.subr.bf16.mxu0 %v1621_v40  ;;  %v199_v40 = vsel %vm184_vm0, %v132_v30, %v182_v31  ;;  %v1746_v30 = vld [vmem:[#allocation7 + $0x3d4] ss:$8 sps:$4 sm:$0xff]   ;;  %v1741_v31 = vld [vmem:[#allocation7 + $0x1d0] ss:$8 sps:$4 sm:$0xff]  }
  0x6f   :  { %1016 = vmatpush1.bf16.msra.mxu1 %v1623_v41  ;;  %v215_v41 = vsel %vm184_vm0, %v133_v32, %v183_v33  ;;  %v1744_v32 = vld [vmem:[#allocation7 + $0x3d0] ss:$8 sps:$4 sm:$0xff]   ;;  %v1749_v33 = vld [vmem:[#allocation7 + $0x1e4] ss:$8 sps:$4 sm:$0xff]  }
  0x70   :  { %1098 = vmatpush1.bf16.msra.mxu0 %v1624_v44  ;;  %1017 = vmatprep.subr.bf16.mxu1 %v1625_v45  ;;  %v1672_v44 = vld [vmem:[#allocation7 + $0x310] ss:$8 sps:$4 sm:$0xff]   ;;  %v1677_v45 = vld [vmem:[#allocation7 + $0x124] ss:$8 sps:$4 sm:$0xff]  }
  0x71   :  { %1099 = vmatprep.subr.bf16.mxu0 %v1627_v46  ;;  %v1680_v46 = vld [vmem:[#allocation7 + $0x324] ss:$8 sps:$4 sm:$0xff]  }
  0x73   :  { %1018 = vmatpush1.bf16.msra.mxu1 %v1629_v47  ;;  %v1675_v47 = vld [vmem:[#allocation7 + $0x120] ss:$8 sps:$4 sm:$0xff]  }
  0x74   :  { %1100 = vmatpush1.bf16.msra.mxu0 %v1630_v48  ;;  %1019 = vmatprep.subr.bf16.mxu1 %v1631_v50  ;;  %v1678_v48 = vld [vmem:[#allocation7 + $0x320] ss:$8 sps:$4 sm:$0xff]   ;;  %v1686_v50 = vld [vmem:[#allocation7 + $0x334] ss:$8 sps:$4 sm:$0xff]  }
  0x75   :  { %1101 = vmatprep.subr.bf16.mxu0 %v1633_v51  ;;  %v1681_v51 = vld [vmem:[#allocation7 + $0x130] ss:$8 sps:$4 sm:$0xff]  }
  0x77   :  { %1020 = vmatpush1.bf16.msra.mxu1 %v1635_v56  ;;  %v1690_v56 = vld [vmem:[#allocation7 + $0x340] ss:$8 sps:$4 sm:$0xff]  }
  0x78   :  { %1102 = vmatpush1.bf16.msra.mxu0 %v1636_v57  ;;  %1021 = vmatprep.subr.bf16.mxu1 %v1637_v60  ;;  %v1695_v57 = vld [vmem:[#allocation7 + $0x154] ss:$8 sps:$4 sm:$0xff]   ;;  %v1696_v60 = vld [vmem:[#allocation7 + $0x350] ss:$8 sps:$4 sm:$0xff]  }
  0x79   :  { %1103 = vmatprep.subr.bf16.mxu0 %v1639_v61  ;;  %v1701_v61 = vld [vmem:[#allocation7 + $0x164] ss:$8 sps:$4 sm:$0xff]  }
  0x7b   :  { %1022 = vmatpush1.bf16.msra.mxu1 %v1641_v3  ;;  %v1705_v3 = vld [vmem:[#allocation7 + $0x170] ss:$8 sps:$4 sm:$0xff]  }
  0x7c   :  { %1104 = vmatpush1.bf16.msra.mxu0 %v1642_v4  ;;  %1023 = vmatprep.subr.bf16.mxu1 %v1643_v8  ;;  %v1708_v4 = vld [vmem:[#allocation7 + $0x370] ss:$8 sps:$4 sm:$0xff]   ;;  %v1714_v8 = vld [vmem:[#allocation7 + $0x380] ss:$8 sps:$4 sm:$0xff]  }
  0x7d   :  { %1105 = vmatprep.subr.bf16.mxu0 %v1645_v9  ;;  %v1719_v9 = vld [vmem:[#allocation7 + $0x194] ss:$8 sps:$4 sm:$0xff]  }
  0x7f   :  { %1024 = vmatpush1.bf16.msra.mxu1 %v1647_v13  ;;  %v1725_v13 = vld [vmem:[#allocation7 + $0x1a4] ss:$8 sps:$4 sm:$0xff]  }
  0x80   :  { %1106 = vmatpush1.bf16.msra.mxu0 %v1648_v14  ;;  %1025 = vmatprep.subr.bf16.mxu1 %v1649_v16  ;;  %v1728_v14 = vld [vmem:[#allocation7 + $0x3a4] ss:$8 sps:$4 sm:$0xff]   ;;  %v1726_v16 = vld [vmem:[#allocation7 + $0x3a0] ss:$8 sps:$4 sm:$0xff]  }
  0x81   :  { %1107 = vmatprep.subr.bf16.mxu0 %v1651_v17  ;;  %v1731_v17 = vld [vmem:[#allocation7 + $0x1b4] ss:$8 sps:$4 sm:$0xff]  }
  0x83   :  { %1026 = vmatpush1.bf16.msra.mxu1 %v1653_v18  ;;  %v1734_v18 = vld [vmem:[#allocation7 + $0x3b4] ss:$8 sps:$4 sm:$0xff]  }
  0x84   :  { %1108 = vmatpush1.bf16.msra.mxu0 %v1654_v19  ;;  %1027 = vmatprep.subr.bf16.mxu1 %v1655_v20  ;;  %v1729_v19 = vld [vmem:[#allocation7 + $0x1b0] ss:$8 sps:$4 sm:$0xff]  }
  0x85   :  { %1109 = vmatprep.subr.bf16.mxu0 %v1657_v21  ;;  %v1732_v20 = vld [vmem:[#allocation7 + $0x3b0] ss:$8 sps:$4 sm:$0xff]   ;;  %v1737_v21 = vld [vmem:[#allocation7 + $0x1c4] ss:$8 sps:$4 sm:$0xff]  }
  0x87   :  { %1028 = vmatpush1.bf16.msra.mxu1 %v1659_v23  ;;  %v1740_v23 = vld [vmem:[#allocation7 + $0x3c4] ss:$8 sps:$4 sm:$0xff]  }
  0x88   :  { %1110 = vmatpush1.bf16.msra.mxu0 %v1660_v24  ;;  %1038 = vmatprep.subr.bf16.mxu1 %v1664_v28  ;;  %v1735_v24 = vld [vmem:[#allocation7 + $0x1c0] ss:$8 sps:$4 sm:$0xff]  }
  0x89   :  { %1120 = vmatprep.subr.bf16.mxu0 %v1668_v29  ;;  %v1738_v28 = vld [vmem:[#allocation7 + $0x3c0] ss:$8 sps:$4 sm:$0xff]   ;;  %v1743_v29 = vld [vmem:[#allocation7 + $0x1d4] ss:$8 sps:$4 sm:$0xff]  }
  0x8a   :  { %1030 = vmatmul.mubr.bf16.vlgmr.msra.gmra.mrb[0].mxu1 %v187_v36  ;;  %v1750_v36 = vld [vmem:[#allocation7 + $0x3e0] ss:$8 sps:$4 sm:$0xff]  }
  0x8b   :  { %1112 = vmatmul.mubr.bf16.vlgmr.msra.gmra.mrb[0].mxu0 %v203_v37  ;;  %1039 = vmatpush1.bf16.msra.mxu1 %v1662_v34  ;;  %v1752_v34 = vld [vmem:[#allocation7 + $0x3e4] ss:$8 sps:$4 sm:$0xff]   ;;  %v1755_v37 = vld [vmem:[#allocation7 + $0x1f4] ss:$8 sps:$4 sm:$0xff]  }
  0x8c   :  { %1121 = vmatpush1.bf16.msra.mxu0 %v1666_v35  ;;  %1040 = vmatprep.subr.bf16.mxu1 %v1671_v38  ;;  %v1747_v35 = vld [vmem:[#allocation7 + $0x1e0] ss:$8 sps:$4 sm:$0xff]   ;;  %v1758_v38 = vld [vmem:[#allocation7 + $0x3f4] ss:$8 sps:$4 sm:$0xff]  }
  0x8d   :  { %1122 = vmatprep.subr.bf16.mxu0 %v1674_v39  ;;  %1070 = vmatprep.mubr.bf16.mxu1 %v199_v40  ;;  %v130_v39 = vcombine.high %v1991_v22, %v1991_v22  ;;  %v1753_v40 = vld [vmem:[#allocation7 + $0x1f0] ss:$8 sps:$4 sm:$0xff]  }
  0x8e   :  { %1152 = vmatprep.mubr.bf16.mxu0 %v215_v41  ;;  %v1756_v41 = vld [vmem:[#allocation7 + $0x3f0] ss:$8 sps:$4 sm:$0xff]  }
  0x8f   :  { %1041 = vmatpush1.bf16.msra.mxu1 %v1669_v42  ;;  %v180_v42 = vcombine.high %v1994_v25, %v1994_v25  ;;  %v1762_v25 = vld [vmem:[#allocation8 + $0x8] sm:$0xff]  }
  0x90   :  { %1123 = vmatpush1.bf16.msra.mxu0 %v1672_v44  ;;  %1042 = vmatprep.subr.bf16.mxu1 %v1677_v45  ;;  %v131_v44 = vcombine.high %v1997_v26, %v1997_v26  ;;  %v181_v45 = vcombine.high %v2000_v27, %v2000_v27  ;;  %v1763_v26 = vld [vmem:[#allocation8 + $0x50] sm:$0xff]  }
  0x91   :  { %1124 = vmatprep.subr.bf16.mxu0 %v1680_v46  ;;  %v1759_v46 = vld [vmem:[#allocation8 + $0x40] sm:$0xff]   ;;  %v195_v22 = vsel %vm184_vm0, %v130_v39, %v180_v42  ;;  %v1764_v27 = vld [vmem:[#allocation8 + $0x10] sm:$0xff]  }
  0x93   :  { %1043 = vmatpush1.bf16.msra.mxu1 %v1675_v47  ;;  %v211_v47 = vsel %vm184_vm0, %v131_v44, %v181_v45 }
  0x94   :  { %1125 = vmatpush1.bf16.msra.mxu0 %v1678_v48  ;;  %1044 = vmatprep.subr.bf16.mxu1 %v1683_v49  ;;  %v1760_v48 = vld [vmem:[#allocation8] sm:$0xff]   ;;  %v1761_v49 = vld [vmem:[#allocation8 + $0x48] sm:$0xff]  }
  0x95   :  { %1126 = vmatprep.subr.bf16.mxu0 %v1686_v50  ;;  %v1765_v50 = vld [vmem:[#allocation8 + $0x58] sm:$0xff]  }
  0x97   :  { %1045 = vmatpush1.bf16.msra.mxu1 %v1681_v51  ;;  %v1766_v51 = vld [vmem:[#allocation8 + $0x18] sm:$0xff]  }
  0x98   :  { %1127 = vmatpush1.bf16.msra.mxu0 %v1684_v52  ;;  %1046 = vmatprep.subr.bf16.mxu1 %v1689_v53  ;;  %v1767_v52 = vld [vmem:[#allocation8 + $0x60] sm:$0xff]  }
  0x99   :  { %1128 = vmatprep.subr.bf16.mxu0 %v1692_v54  ;;  %v1768_v53 = vld [vmem:[#allocation8 + $0x20] sm:$0xff]   ;;  %v1769_v54 = vld [vmem:[#allocation8 + $0x68] sm:$0xff]  }
  0x9b   :  { %1047 = vmatpush1.bf16.msra.mxu1 %v1687_v55  ;;  %v1770_v55 = vld [vmem:[#allocation8 + $0x28] sm:$0xff]  }
  0x9c   :  { %1129 = vmatpush1.bf16.msra.mxu0 %v1690_v56  ;;  %1048 = vmatprep.subr.bf16.mxu1 %v1695_v57  ;;  %v1771_v56 = vld [vmem:[#allocation8 + $0x70] sm:$0xff]  }
  0x9d   :  { %1130 = vmatprep.subr.bf16.mxu0 %v1698_v58  ;;  %v1772_v57 = vld [vmem:[#allocation8 + $0x30] sm:$0xff]   ;;  %v1773_v58 = vld [vmem:[#allocation8 + $0x78] sm:$0xff]  }
  0x9f   :  { %1049 = vmatpush1.bf16.msra.mxu1 %v1693_v59  ;;  %v1774_v59 = vld [vmem:[#allocation8 + $0x38] sm:$0xff]  }
  0xa0   :  { %1131 = vmatpush1.bf16.msra.mxu0 %v1696_v60  ;;  %1050 = vmatprep.subr.bf16.mxu1 %v1701_v61  ;;  %v349_v60 = vsub.s32 0, %v1975_v43  ;;  %v345_v61 = vld [vmem:[%s2040_s3] sm:$0x3] }
  0xa1   :  { %1132 = vmatprep.subr.bf16.mxu0 %v1704_v62  ;;  %v353_v62 = vsub.s32 1, %v1975_v43 }
  0xa3   :  { %1051 = vmatpush1.bf16.msra.mxu1 %v1699_v63  ;;  %v350_v63 = vrot.slane %v345_v61, %v349_v60 }
  0xa4   :  { %1133 = vmatpush1.bf16.msra.mxu0 %v1702_v0  ;;  %1052 = vmatprep.subr.bf16.mxu1 %v1707_v1  ;;  %v354_v0 = vrot.slane %v345_v61, %v353_v62 }
  0xa5   :  { %1134 = vmatprep.subr.bf16.mxu0 %v1710_v2 }
  0xa7   :  { %1053 = vmatpush1.bf16.msra.mxu1 %v1705_v3 }
  0xa8   :  { %1135 = vmatpush1.bf16.msra.mxu0 %v1708_v4  ;;  %1054 = vmatprep.subr.bf16.mxu1 %v1713_v5 }
  0xa9   :  { %1136 = vmatprep.subr.bf16.mxu0 %v1716_v6 }
  0xab   :  { %1055 = vmatpush1.bf16.msra.mxu1 %v1711_v7 }
  0xac   :  { %1137 = vmatpush1.bf16.msra.mxu0 %v1714_v8  ;;  %1056 = vmatprep.subr.bf16.mxu1 %v1719_v9 }
  0xad   :  { %1138 = vmatprep.subr.bf16.mxu0 %v1722_v10 }
  0xaf   :  { %1057 = vmatpush1.bf16.msra.mxu1 %v1717_v11 }
  0xb0   :  { %1139 = vmatpush1.bf16.msra.mxu0 %v1720_v12  ;;  %1058 = vmatprep.subr.bf16.mxu1 %v1725_v13 }
  0xb1   :  { %1140 = vmatprep.subr.bf16.mxu0 %v1728_v14 }
  0xb3   :  { %1059 = vmatpush1.bf16.msra.mxu1 %v1723_v15 }
  0xb4   :  { %1141 = vmatpush1.bf16.msra.mxu0 %v1726_v16  ;;  %1060 = vmatprep.subr.bf16.mxu1 %v1731_v17  ;;  %v1503_v17 = vld [vmem:[%s2042_s5] ss:$0 sm:$0xff] }
  0xb5   :  { %1142 = vmatprep.subr.bf16.mxu0 %v1734_v18 }
  0xb7   :  { %1061 = vmatpush1.bf16.msra.mxu1 %v1729_v19 }
  0xb8   :  { %1143 = vmatpush1.bf16.msra.mxu0 %v1732_v20  ;;  %1062 = vmatprep.subr.bf16.mxu1 %v1737_v21 }
  0xb9   :  { %1144 = vmatprep.subr.bf16.mxu0 %v1740_v23 }
  0xbb   :  { %1063 = vmatpush1.bf16.msra.mxu1 %v1735_v24 }
  0xbc   :  { %1145 = vmatpush1.bf16.msra.mxu0 %v1738_v28  ;;  %1064 = vmatprep.subr.bf16.mxu1 %v1743_v29  ;;  %v1520_v29 = vld [vmem:[%s2043_s6] ss:$0 sm:$0xff] }
  0xbd   :  { %1146 = vmatprep.subr.bf16.mxu0 %v1746_v30 }
  0xbf   :  { %1065 = vmatpush1.bf16.msra.mxu1 %v1741_v31 }
  0xc0   :  { %1147 = vmatpush1.bf16.msra.mxu0 %v1744_v32  ;;  %1066 = vmatprep.subr.bf16.mxu1 %v1749_v33  ;;  %v1358_v33 = vstv %s2044_s7 }
  0xc1   :  { %1148 = vmatprep.subr.bf16.mxu0 %v1752_v34 }
  0xc3   :  { %1067 = vmatpush1.bf16.msra.mxu1 %v1747_v35 }
  0xc4   :  { %1149 = vmatpush1.bf16.msra.mxu0 %v1750_v36  ;;  %1068 = vmatprep.subr.bf16.mxu1 %v1755_v37 }
  0xc5   :  { %1150 = vmatprep.subr.bf16.mxu0 %v1758_v38 }
  0xc7   :  { %1069 = vmatpush1.bf16.msra.mxu1 %v1753_v40 }
  0xc8   :  { %1151 = vmatpush1.bf16.msra.mxu0 %v1756_v41  ;;  %1522 = vmatprep.subr.bf16.mxu1 %v1759_v46 }
  0xca   :  { %1071 = vmatmul.mubr.bf16.vlgmr.msra.gmra.mrb[0].mxu1 %v195_v22 }
  0xcb   :  { %1153 = vmatmul.mubr.bf16.vlgmr.msra.gmra.mrb[0].mxu0 %v211_v47  ;;  %1523 = vmatpush3.bf16.msra.mxu1 %v1760_v48 }
  0xcc   :  { %1524 = vmatprep.subr.bf16.mxu1 %v1761_v49 }
  0xcf   :  { %1525 = vmatpush3.bf16.msra.mxu1 %v1762_v25 }
  0xd0   :  { %1526 = vmatprep.subr.bf16.mxu1 %v1763_v26 }
  0xd3   :  { %1527 = vmatpush3.bf16.msra.mxu1 %v1764_v27 }
  0xd4   :  { %1528 = vmatprep.subr.bf16.mxu1 %v1765_v50 }
  0xd7   :  { %1529 = vmatpush3.bf16.msra.mxu1 %v1766_v51 }
  0xd8   :  { %1530 = vmatprep.subr.bf16.mxu1 %v1767_v52 }
  0xdb   :  { %1531 = vmatpush3.bf16.msra.mxu1 %v1768_v53 }
  0xdc   :  { %1532 = vmatprep.subr.bf16.mxu1 %v1769_v54 }
  0xdf   :  { %1533 = vmatpush3.bf16.msra.mxu1 %v1770_v55 }
  0xe0   :  { %1534 = vmatprep.subr.bf16.mxu1 %v1771_v56 }
  0xe3   :  { %1535 = vmatpush3.bf16.msra.mxu1 %v1772_v57 }
  0xe4   :  { %1536 = vmatprep.subr.bf16.mxu1 %v1773_v58 }
  0xe7   :  { %1537 = vmatpush3.bf16.msra.mxu1 %v1774_v59 }
 0x19d   :  { %v1072_v1 = vpop.f32.mrb[0].mxu1 }
 0x19e   :  { %v1154_v2 = vpop.f32.mrb[0].mxu0  ;;  %v1544_v3 = vadd.f32 %v1072_v1, %v350_v63  ;;  %v1074_v4 = vpop.f32.mrb[1].mxu1 }
 0x19f   :  { %v1156_v5 = vpop.f32.mrb[1].mxu0  ;;  %v1546_v6 = vadd.f32 %v1074_v4, %v354_v0  ;;  %v1076_v7 = vpop.f32.mrb[2].mxu1 }
 0x1a0   :  { %v1158_v8 = vpop.f32.mrb[2].mxu0  ;;  %v1545_v9 = vadd.f32 %v1544_v3, %v1154_v2  ;;  %v1077_v10 = vpop.f32.mrb[3].mxu1 }
 0x1a1   :  { %v1159_v11 = vpop.f32.mrb[3].mxu0  ;;  %v1547_v12 = vadd.f32 %v1546_v6, %v1156_v5 }
 0x1a2   :  { %v1161_v13 = vmax.f32 %v1545_v9, 0.0 }
 0x1a3   :  { %v1162_v14 = vmax.f32 %v1547_v12, 0.0 }
 0x1a4   :  { %v1163_v16 = vpack.c.bf16 %v1161_v13, %v1161_v13 }
 0x1a5   :  { %v1164_v15 = vpack.c.bf16 %v1162_v14, %v1162_v14 }
 0x1a7   :  { %1332 = vmatprep.mubr.bf16.mxu1 %v1164_v15 }
 0x1a8   :  { %1333 = vmatmul.mubr.bf16.vlgmr.msra.gmra.mrb[4].mxu1 %v1163_v16 }
 0x27b   :  { %v1538_v43 = vpop.f32.mrb[4].mxu1 }
 0x27c   :  { %v1539_v18 = vpop.f32.mrb[5].mxu1 }
 0x27d   :  { %v1540_v19 = vadd.f32 %v1539_v18, %v1538_v43  ;;  %v1541_v20 = vpop.f32.mrb[6].mxu1 }
 0x27e   :  { %v1542_v21 = vpop.f32.mrb[7].mxu1 }
 0x27f   :  { %v1335_v23 = vadd.f32 %v1540_v19, %v1503_v17 }
 0x281   :  { %v1341_v24 = vrot.slane %v1335_v23, 2 }
 0x283   :  { %v1343_v28 = vsub.f32 %v1335_v23, %v1341_v24 }
 0x285   :  { %v1344_v30 = vand.u32 2147483647, %v1343_v28 }
 0x287   :  { %v1352_v31 = vmul.f32 %v1520_v29, %v1344_v30 }
 0x289   :  { %v1354_v32 = vsel %vm1353_vm1, %v1352_v31, 0.0 }
 0x28a   :  { %1355 = vadd.xlane.f32.xlu0 %v1354_v32 }
 0x317   :  { %v1356_v34 = vpop.xlane.xlu0 %1355 }
 0x318   :  { %v1359_v35 = vadd.f32 %v1358_v33, %v1356_v34 }
 0x31a   :  { %v1521_v36 = vmul.f32 -1.442695, %v1359_v35 }
 0x31c   :  { %1775 = vpow2.f32 %v1521_v36 }
 0x326   :  { %v1776_v37 = vpop.eup %1775 }
 0x327   :  { %v1363_v38 = vadd.f32 1.0, %v1776_v37 }
 0x329   :  { %1777 = vrcp.f32 %v1363_v38 }
 0x333   :  { %v1778_v39 = vpop.eup %1777 }
 0x334   :  { %1367 = vst.msk [vmem:[%s2045_s8] sm:$0x3] %vm1366_vm2, %v1778_v39 }
 0x335   :  { %1372 = vsyncpa [#allocation4], 1 }
 0x336   :  { %1373 = vsyncpa [#allocation6], 1 }
 0x337   :  { %1374 = vsyncpa [#allocation9], 1 }

</bundles_post_ra>
